<compile_context>
chip_gen: v6e
topology: v6e:2x2x1
jax: 0.10.0
libtpu: 0.0.40
codegen_flags: <defaults>
</compile_context>

<pallas_src>
import jax
import jax.numpy as jnp
from jax.experimental import pallas as pl
from jax.experimental.pallas import tpu as pltpu


def _row_align(dtype) -> int:
    """Minimum sublane multiple for the row tile, by element width."""
    itemsize = jnp.dtype(dtype).itemsize
    return {4: 8, 2: 16, 1: 32}.get(itemsize, 8)


def _round_up(n: int, m: int) -> int:
    return ((n + m - 1) // m) * m


def _choose_pack(M: int, H: int, C: int) -> int:
    """Pick p so that p consecutive rows are packed into one lane-dense row.

    The kernel then computes (tm, p*H) @ blockdiag_p(W) -> (tm, p*C).
    p*C <= 128 keeps the p-fold FLOP blow-up of the block-diagonal matmul
    safely memory-bound while giving (ideally) a full 128-lane output.
    """
    for p in (32, 16, 8, 4, 2):
        if M % p == 0 and p * C <= 128 and p * H <= 4096:
            return p
    return 1


def _linear_kernel(x_ref, w_ref, b_ref, o_ref):
    # x_ref: (TM, Hp), w_ref: (Hp, Cp), b_ref: (1, Cp) f32, o_ref: (TM, Cp)
    acc = jnp.dot(x_ref[...], w_ref[...], preferred_element_type=jnp.float32)
    o_ref[...] = (acc + b_ref[...]).astype(o_ref.dtype)


def _linear_pallas(x2d, weight, bias2d, *, tm):
    M, H = x2d.shape
    _, C = weight.shape
    grid = (pl.cdiv(M, tm),)
    itemsize = jnp.dtype(x2d.dtype).itemsize
    cost = pl.CostEstimate(
        flops=2 * M * H * C,
        transcendentals=0,
        bytes_accessed=(M * H + H * C + C + M * C) * itemsize,
    )
    return pl.pallas_call(
        _linear_kernel,
        out_shape=jax.ShapeDtypeStruct((M, C), x2d.dtype),
        grid_spec=pltpu.PrefetchScalarGridSpec(
            num_scalar_prefetch=0,
            grid=grid,
            in_specs=[
                pl.BlockSpec((tm, H), lambda i: (i, 0)),  # x row tile
                pl.BlockSpec((H, C), lambda i: (0, 0)),   # full weight, resident
                pl.BlockSpec((1, C), lambda i: (0, 0)),   # bias row, resident
            ],
            out_specs=pl.BlockSpec((tm, C), lambda i: (i, 0)),
        ),
        compiler_params=pltpu.CompilerParams(
            dimension_semantics=("parallel",),
        ),
        cost_estimate=cost,
    )(x2d, weight, bias2d)


def thinking_of_latents_forward(x, weight, bias, *, training=False, noise=None, tm=1024):
    """JAX/Pallas equivalent of ThinkingOfLatents.forward.

    x:      [..., hidden_dim]
    weight: [hidden_dim, n_classes]
    bias:   [n_classes]
    """
    hidden_dim, n_classes = weight.shape
    eps = 1e-12

    if training:
        # Conjugate-noise perturbation of the weights (tiny parameter-space
        # glue; matches torch.nn.functional.normalize semantics w/ eps clamp).
        if noise is None:
            raise ValueError("training=True requires an explicit noise array [1, hidden_dim]")
        wt = weight.T                                            # [C, H]
        wt_norm = jnp.maximum(jnp.linalg.norm(wt, axis=1, keepdims=True), eps)
        normalized = wt / wt_norm                                # [C, H]
        projections = noise @ normalized.T                       # [1, C]
        weight_space_component = projections @ normalized        # [1, H]
        conj = noise - weight_space_component
        conj = conj / jnp.maximum(jnp.linalg.norm(conj, axis=1, keepdims=True), eps)
        noise_scale = jnp.linalg.norm(weight, axis=0).mean()
        weights_eff = weight + conj.T * noise_scale
    else:
        weights_eff = weight

    lead_shape = x.shape[:-1]
    x2d = x.reshape(-1, hidden_dim)
    M = x2d.shape[0]

    compute_dtype = x2d.dtype
    # NOTE: matches previous behavior; if x is bf16 this downcasts the
    # (possibly perturbed) f32 weights — exact for the f32 default dtype.
    w = weights_eff.astype(compute_dtype)
    b = bias.astype(jnp.float32)

    # ---- lane-dense repack (free contiguous reshape of x; tiny weight kron) ----
    p = _choose_pack(M, hidden_dim, n_classes)
    if p > 1:
        x_packed = x2d.reshape(M // p, p * hidden_dim)
        w_packed = jnp.kron(jnp.eye(p, dtype=compute_dtype), w)     # block-diagonal
        b_packed = jnp.tile(b, p).reshape(1, p * n_classes)
    else:
        x_packed = x2d
        w_packed = w
        b_packed = b.reshape(1, n_classes)

    Mp = x_packed.shape[0]
    row_align = _row_align(compute_dtype)
    tm_eff = max(row_align, min(int(tm), _round_up(Mp, row_align)))
    tm_eff = _round_up(tm_eff, row_align)

    out_packed = _linear_pallas(x_packed, w_packed, b_packed, tm=tm_eff)
    out2d = out_packed.reshape(M, n_classes)

    out = out2d.reshape(*lead_shape, n_classes)
    # Mimic torch's .squeeze() (drops all size-1 dims).
    return jnp.squeeze(out)


if __name__ == "__main__":
    hidden_dim, n_classes = 32, 4
    key = jax.random.PRNGKey(0)
    k_w, k_x1, k_x2 = jax.random.split(key, 3)

    weight = jax.random.normal(k_w, (hidden_dim, n_classes), dtype=jnp.float32)
    bias = jnp.zeros((n_classes,), dtype=jnp.float32)

    # Case 1: small, pack-friendly shape (batch=2, seq=8) -> M=16, packed path.
    x1 = jax.random.normal(k_x1, (2, 8, hidden_dim), dtype=jnp.float32)
    out1 = jax.block_until_ready(thinking_of_latents_forward(x1, weight, bias, training=False))
    ref1 = jnp.squeeze(x1 @ weight + bias)
    assert out1.shape == ref1.shape
    assert jnp.allclose(out1, ref1, atol=1e-5, rtol=1e-5)

    # Case 2: ragged row count (M=15) -> unpacked path + cdiv-masked last block.
    x2 = jax.random.normal(k_x2, (3, 5, hidden_dim), dtype=jnp.float32)
    out2 = jax.block_until_ready(thinking_of_latents_forward(x2, weight, bias, training=False))
    ref2 = jnp.squeeze(x2 @ weight + bias)
    assert out2.shape == ref2.shape
    assert jnp.allclose(out2, ref2, atol=1e-5, rtol=1e-5)

    # TODO(synk): training-mode noise uses torch.randn inside forward; here it
    # must be supplied explicitly (handled in plain JAX glue, not in the kernel).

    print("KERNEL_OK")
</pallas_src>

<mosaic_0001>
module attributes {stable_mosaic.version = 11 : i64} {
  func.func @_linear_kernel(%arg0: i32, %arg1: memref<8x512xf32, #tpu.memory_space<vmem>>, %arg2: memref<512x64xf32, #tpu.memory_space<vmem>>, %arg3: memref<1x64xf32, #tpu.memory_space<vmem>>, %arg4: memref<8x64xf32, #tpu.memory_space<vmem>>) attributes {dimension_semantics = [#tpu.dimension_semantics<parallel>], iteration_bounds = array<i64: 1>, scalar_prefetch = 0 : i64, scratch_operands = 0 : i64, tpu.core_type = #tpu.core_type<tc>, window_params = [{transform_indices = @transform_0, window_bounds = array<i64: 8, 512>}, {pipeline_mode = #tpu.pipeline_mode<synchronous>, transform_indices = @transform_1, window_bounds = array<i64: 512, 64>}, {pipeline_mode = #tpu.pipeline_mode<synchronous>, transform_indices = @transform_2, window_bounds = array<i64: 1, 64>}, {transform_indices = @transform_3, window_bounds = array<i64: 8, 64>}]} {
    %c0 = arith.constant 0 : index
    %c0_0 = arith.constant 0 : index
    %0 = vector.load %arg1[%c0, %c0_0] : memref<8x512xf32, #tpu.memory_space<vmem>>, vector<8x512xf32>
    %c0_1 = arith.constant 0 : index
    %c0_2 = arith.constant 0 : index
    %1 = vector.load %arg2[%c0_1, %c0_2] : memref<512x64xf32, #tpu.memory_space<vmem>>, vector<512x64xf32>
    %cst = arith.constant dense<0.000000e+00> : vector<8x64xf32>
    %2 = tpu.matmul %0, %1, %cst {dimension_numbers = #tpu.dot_dimension_numbers<[1], [0], [0], [1], [0, 0, 1, 1], [], []>} : vector<8x512xf32>, vector<512x64xf32>, vector<8x64xf32> -> vector<8x64xf32>
    %c0_3 = arith.constant 0 : index
    %c0_4 = arith.constant 0 : index
    %3 = vector.load %arg3[%c0_3, %c0_4] : memref<1x64xf32, #tpu.memory_space<vmem>>, vector<1x64xf32>
    %4 = vector.broadcast %3 : vector<1x64xf32> to vector<8x64xf32>
    %5 = arith.addf %2, %4 : vector<8x64xf32>
    %c0_5 = arith.constant 0 : index
    %c0_6 = arith.constant 0 : index
    %6 = vector.load %arg4[%c0_5, %c0_6] : memref<8x64xf32, #tpu.memory_space<vmem>>, vector<8x64xf32>
    tpu.vector_store %arg4[%c0_5, %c0_6], %5 {strides = array<i32>} : memref<8x64xf32, #tpu.memory_space<vmem>>, vector<8x64xf32>,
    return
  }
  func.func @transform_0(%arg0: i32) -> (i32, i32) {
    %c0_i32 = arith.constant 0 : i32
    %c0_i32_0 = arith.constant 0 : i32
    return %arg0, %c0_i32 : i32, i32
  }
  func.func @transform_1(%arg0: i32) -> (i32, i32) {
    %c0_i32 = arith.constant 0 : i32
    %c0_i32_0 = arith.constant 0 : i32
    %c0_i32_1 = arith.constant 0 : i32
    return %c0_i32, %c0_i32_0 : i32, i32
  }
  func.func @transform_2(%arg0: i32) -> (i32, i32) {
    %c0_i32 = arith.constant 0 : i32
    %c0_i32_0 = arith.constant 0 : i32
    %c0_i32_1 = arith.constant 0 : i32
    return %c0_i32, %c0_i32_0 : i32, i32
  }
  func.func @transform_3(%arg0: i32) -> (i32, i32) {
    %c0_i32 = arith.constant 0 : i32
    %c0_i32_0 = arith.constant 0 : i32
    return %arg0, %c0_i32 : i32, i32
  }
}

</mosaic_0001>

<bundles_post_ra>
// kernel: tpu_custom_call.1
= control target key start
LH: loop header
LB: loop body
LE: loop exit
PB: predicated region body
PF: predicated region fallthrough
CT: control target
= control target key end

     0   :  { %8 = vsyncpa [#allocation3], 0  ;;  %v437_v34 = vmov 1966171168   ;;  %v109_v36 = vlaneseq  ;;  %vm314_vm0 = vcmask 523264   ;;  %s671_s0 = inlined_call_operand.vmem [shape: f32[1,512], index: 0, kind: input, shape index: {}]   ;;  %s672_s1 = inlined_call_operand.vmem [shape: f32[512,64], index: 1, kind: input, shape index: {}]   ;;  %s673_s2 = inlined_call_operand.vmem [shape: f32[1,64], index: 2, kind: input, shape index: {}]   ;;  %s674_s3 = inlined_call_operand.hbm [shape: f32[1,64], index: 3, kind: output, shape index: {}]  }
   0x1   :  { %v54_v0 = vld [vmem:[%s672_s1 + $0xf8] sm:$0xff]  ;;  %v53_v4 = vld [vmem:[%s672_s1 + $0xf0] sm:$0xff]  ;;  %v52_v8 = vld [vmem:[%s672_s1 + $0xe8] sm:$0xff]  ;;  %v107_v35 = vunpack.c.l.s4 %v437_v34 }
   0x2   :  { %v86_v1 = vld [vmem:[%s672_s1 + $0x1f8] sm:$0xff]  ;;  %333 = vmatprep.subr.mxu0 %v54_v0  ;;  %v85_v5 = vld [vmem:[%s672_s1 + $0x1f0] sm:$0xff]  ;;  %v84_v9 = vld [vmem:[%s672_s1 + $0x1e8] sm:$0xff]  ;;  %v110_v48 = vshrl.u32 %v109_v36, 7 }
   0x3   :  { %368 = vmatprep.subr.mxu1 %v86_v1  ;;  %v38_v2 = vld [vmem:[%s672_s1 + $0x78] sm:$0xff]  ;;  %v37_v6 = vld [vmem:[%s672_s1 + $0x70] sm:$0xff]  ;;  %v36_v10 = vld [vmem:[%s672_s1 + $0x68] sm:$0xff]  ;;  %v108_v47 = vunpack.c.0.s8 %v107_v35 }
   0x4   :  { %v70_v3 = vld [vmem:[%s672_s1 + $0x178] sm:$0xff]  ;;  %334 = vmatpush3.msra.mxu0 %v38_v2  ;;  %v69_v7 = vld [vmem:[%s672_s1 + $0x170] sm:$0xff]  ;;  %v68_v11 = vld [vmem:[%s672_s1 + $0x168] sm:$0xff] }
   0x5   :  { %369 = vmatpush3.msra.mxu1 %v70_v3  ;;  %335 = vmatprep.subr.mxu0 %v53_v4  ;;  %v51_v12 = vld [vmem:[%s672_s1 + $0xe0] sm:$0xff]  ;;  %v50_v16 = vld [vmem:[%s672_s1 + $0xd8] sm:$0xff]  ;;  %v49_v20 = vld [vmem:[%s672_s1 + $0xd0] sm:$0xff]  ;;  %v111_v59 = vsub.s32 %v108_v47, %v110_v48 }
   0x6   :  { %370 = vmatprep.subr.mxu1 %v85_v5  ;;  %336 = vmatpush3.msra.mxu0 %v37_v6  ;;  %v83_v13 = vld [vmem:[%s672_s1 + $0x1e0] sm:$0xff]  ;;  %v82_v17 = vld [vmem:[%s672_s1 + $0x1d8] sm:$0xff]  ;;  %v81_v21 = vld [vmem:[%s672_s1 + $0x1d0] sm:$0xff] }
   0x7   :  { %371 = vmatpush3.msra.mxu1 %v69_v7  ;;  %337 = vmatprep.subr.mxu0 %v52_v8  ;;  %v35_v14 = vld [vmem:[%s672_s1 + $0x60] sm:$0xff]  ;;  %v34_v18 = vld [vmem:[%s672_s1 + $0x58] sm:$0xff]  ;;  %v33_v22 = vld [vmem:[%s672_s1 + $0x50] sm:$0xff] }
   0x8   :  { %372 = vmatprep.subr.mxu1 %v84_v9  ;;  %v67_v15 = vld [vmem:[%s672_s1 + $0x160] sm:$0xff]  ;;  %338 = vmatpush3.msra.mxu0 %v36_v10  ;;  %v66_v19 = vld [vmem:[%s672_s1 + $0x158] sm:$0xff]  ;;  %v65_v23 = vld [vmem:[%s672_s1 + $0x150] sm:$0xff] }
   0x9   :  { %373 = vmatpush3.msra.mxu1 %v68_v11  ;;  %339 = vmatprep.subr.mxu0 %v51_v12  ;;  %v48_v24 = vld [vmem:[%s672_s1 + $0xc8] sm:$0xff]  ;;  %v47_v28 = vld [vmem:[%s672_s1 + $0xc0] sm:$0xff]  ;;  %v46_v32 = vld [vmem:[%s672_s1 + $0xb8] sm:$0xff] }
   0xa   :  { %374 = vmatprep.subr.mxu1 %v83_v13  ;;  %340 = vmatpush3.msra.mxu0 %v35_v14  ;;  %v80_v25 = vld [vmem:[%s672_s1 + $0x1c8] sm:$0xff]  ;;  %v79_v29 = vld [vmem:[%s672_s1 + $0x1c0] sm:$0xff]  ;;  %v78_v33 = vld [vmem:[%s672_s1 + $0x1b8] sm:$0xff] }
   0xb   :  { %375 = vmatpush3.msra.mxu1 %v67_v15  ;;  %341 = vmatprep.subr.mxu0 %v50_v16  ;;  %v32_v26 = vld [vmem:[%s672_s1 + $0x48] sm:$0xff]  ;;  %v31_v30 = vld [vmem:[%s672_s1 + $0x40] sm:$0xff]  ;;  %v30_v37 = vld [vmem:[%s672_s1 + $0x38] sm:$0xff] }
   0xc   :  { %376 = vmatprep.subr.mxu1 %v82_v17  ;;  %342 = vmatpush3.msra.mxu0 %v34_v18  ;;  %v64_v27 = vld [vmem:[%s672_s1 + $0x148] sm:$0xff]  ;;  %v63_v31 = vld [vmem:[%s672_s1 + $0x140] sm:$0xff]  ;;  %v62_v38 = vld [vmem:[%s672_s1 + $0x138] sm:$0xff] }
   0xd   :  { %377 = vmatpush3.msra.mxu1 %v66_v19  ;;  %343 = vmatprep.subr.mxu0 %v49_v20  ;;  %v45_v39 = vld [vmem:[%s672_s1 + $0xb0] sm:$0xff]  ;;  %v44_v43 = vld [vmem:[%s672_s1 + $0xa8] sm:$0xff]  ;;  %v43_v49 = vld [vmem:[%s672_s1 + $0xa0] sm:$0xff] }
   0xe   :  { %378 = vmatprep.subr.mxu1 %v81_v21  ;;  %344 = vmatpush3.msra.mxu0 %v33_v22  ;;  %v77_v40 = vld [vmem:[%s672_s1 + $0x1b0] sm:$0xff]  ;;  %v76_v44 = vld [vmem:[%s672_s1 + $0x1a8] sm:$0xff]  ;;  %v75_v50 = vld [vmem:[%s672_s1 + $0x1a0] sm:$0xff] }
   0xf   :  { %379 = vmatpush3.msra.mxu1 %v65_v23  ;;  %345 = vmatprep.subr.mxu0 %v48_v24  ;;  %v29_v41 = vld [vmem:[%s672_s1 + $0x30] sm:$0xff]  ;;  %v28_v45 = vld [vmem:[%s672_s1 + $0x28] sm:$0xff]  ;;  %v27_v51 = vld [vmem:[%s672_s1 + $0x20] sm:$0xff] }
  0x10   :  { %380 = vmatprep.subr.mxu1 %v80_v25  ;;  %346 = vmatpush3.msra.mxu0 %v32_v26  ;;  %v61_v42 = vld [vmem:[%s672_s1 + $0x130] sm:$0xff]  ;;  %v60_v46 = vld [vmem:[%s672_s1 + $0x128] sm:$0xff]  ;;  %v59_v52 = vld [vmem:[%s672_s1 + $0x120] sm:$0xff] }
  0x11   :  { %381 = vmatpush3.msra.mxu1 %v64_v27  ;;  %347 = vmatprep.subr.mxu0 %v47_v28  ;;  %v42_v53 = vld [vmem:[%s672_s1 + $0x98] sm:$0xff]  ;;  %v41_v57 = vld [vmem:[%s672_s1 + $0x90] sm:$0xff]  ;;  %v411_v60 = vld.sshfl [vmem:[%s671_s0] sm:$0xff pattern:$0x75316420] }
  0x12   :  { %382 = vmatprep.subr.mxu1 %v79_v29  ;;  %348 = vmatpush3.msra.mxu0 %v31_v30  ;;  %v74_v54 = vld [vmem:[%s672_s1 + $0x198] sm:$0xff]  ;;  %v73_v58 = vld [vmem:[%s672_s1 + $0x190] sm:$0xff]  ;;  %v412_v61 = vld.sshfl [vmem:[%s671_s0 + $0x8] sm:$0xff pattern:$0x75316420] }
  0x13   :  { %383 = vmatpush3.msra.mxu1 %v63_v31  ;;  %349 = vmatprep.subr.mxu0 %v46_v32  ;;  %v26_v55 = vld [vmem:[%s672_s1 + $0x18] sm:$0xff]  ;;  %v413_v62 = vld.sshfl [vmem:[%s671_s0 + $0x10] sm:$0xff pattern:$0x75316420]  ;;  %v40_v2 = vld [vmem:[%s672_s1 + $0x88] sm:$0xff]  ;;  %v135_v8 = vcombine.high %v411_v60, %v412_v61  ;;  %v134_v9 = vcombine.low %v411_v60, %v412_v61 }
  0x14   :  { %384 = vmatprep.subr.mxu1 %v78_v33  ;;  %350 = vmatpush3.msra.mxu0 %v30_v37  ;;  %v58_v56 = vld [vmem:[%s672_s1 + $0x118] sm:$0xff]  ;;  %v25_v63 = vld [vmem:[%s672_s1 + $0x10] sm:$0xff]  ;;  %v72_v3 = vld [vmem:[%s672_s1 + $0x188] sm:$0xff] }
  0x15   :  { %385 = vmatpush3.msra.mxu1 %v62_v38  ;;  %351 = vmatprep.subr.mxu0 %v45_v39  ;;  %v57_v0 = vld [vmem:[%s672_s1 + $0x110] sm:$0xff]  ;;  %v414_v1 = vld.sshfl [vmem:[%s671_s0 + $0x18] sm:$0xff pattern:$0x75316420]  ;;  %v24_v4 = vld [vmem:[%s672_s1 + $0x8] sm:$0xff]  ;;  %v151_v14 = vrot.slane %v135_v8, %v111_v59  ;;  %v144_v15 = vrot.slane %v134_v9, %v111_v59 }
  0x16   :  { %386 = vmatprep.subr.mxu1 %v77_v40  ;;  %352 = vmatpush3.msra.mxu0 %v29_v41  ;;  %v56_v5 = vld [vmem:[%s672_s1 + $0x108] sm:$0xff]  ;;  %v39_v6 = vld [vmem:[%s672_s1 + $0x80] sm:$0xff]  ;;  %v137_v11 = vcombine.high %v413_v62, %v414_v1  ;;  %v136_v13 = vcombine.low %v413_v62, %v414_v1 }
  0x17   :  { %387 = vmatpush3.msra.mxu1 %v61_v42  ;;  %353 = vmatprep.subr.mxu0 %v44_v43  ;;  %v71_v7 = vld [vmem:[%s672_s1 + $0x180] sm:$0xff] }
  0x18   :  { %388 = vmatprep.subr.mxu1 %v76_v44  ;;  %354 = vmatpush3.msra.mxu0 %v28_v45  ;;  %v23_v10 = vld [vmem:[%s672_s1] sm:$0xff]  ;;  %v165_v16 = vrot.slane %v137_v11, %v111_v59  ;;  %v158_v17 = vrot.slane %v136_v13, %v111_v59 }
  0x19   :  { %389 = vmatpush3.msra.mxu1 %v60_v46  ;;  %355 = vmatprep.subr.mxu0 %v43_v49  ;;  %v55_v12 = vld [vmem:[%s672_s1 + $0x100] sm:$0xff] }
  0x1a   :  { %390 = vmatprep.subr.mxu1 %v75_v50  ;;  %356 = vmatpush3.msra.mxu0 %v27_v51  ;;  %v168_v18 = vcombine.low %v151_v14, %v165_v16  ;;  %v169_v19 = vcombine.high %v151_v14, %v165_v16  ;;  %v166_v20 = vcombine.low %v144_v15, %v158_v17  ;;  %v332_v24 = vld [vmem:[%s673_s2] ss:$0 sm:$0xff] }
  0x1b   :  { %391 = vmatpush3.msra.mxu1 %v59_v52  ;;  %357 = vmatprep.subr.mxu0 %v42_v53  ;;  %v167_v21 = vcombine.high %v144_v15, %v158_v17 }
  0x1c   :  { %392 = vmatprep.subr.mxu1 %v74_v54  ;;  %358 = vmatpush3.msra.mxu0 %v26_v55 }
  0x1d   :  { %393 = vmatpush3.msra.mxu1 %v58_v56  ;;  %359 = vmatprep.subr.mxu0 %v41_v57 }
  0x1e   :  { %394 = vmatprep.subr.mxu1 %v73_v58  ;;  %360 = vmatpush3.msra.mxu0 %v25_v63 }
  0x1f   :  { %395 = vmatpush3.msra.mxu1 %v57_v0  ;;  %361 = vmatprep.subr.mxu0 %v40_v2 }
  0x20   :  { %396 = vmatprep.subr.mxu1 %v72_v3  ;;  %362 = vmatpush3.msra.mxu0 %v24_v4 }
  0x21   :  { %397 = vmatpush3.msra.mxu1 %v56_v5  ;;  %363 = vmatprep.subr.mxu0 %v39_v6 }
  0x22   :  { %398 = vmatprep.subr.mxu1 %v71_v7  ;;  %364 = vmatpush3.msra.mxu0 %v23_v10 }
  0x23   :  { %399 = vmatpush3.msra.mxu1 %v55_v12  ;;  %238 = vmatprep.mubr.f32.mxu0 %v168_v18 }
  0x24   :  { %308 = vmatprep.mubr.f32.mxu1 %v169_v19  ;;  %239 = vmatmul.mubr.f32.vlgmr.msra.gmra.mxu0 %v166_v20 }
  0x25   :  { %309 = vmatmul.mubr.f32.vlgmr.msra.gmra.mxu1 %v167_v21 }
  0xe4   :  { %v365_v22 = vpop.f32.mrf.mxu0 }
  0xe5   :  { %v400_v23 = vpop.f32.mrf.mxu1 }
  0xe6   :  { %v366_v25 = vpop.f32.mrf.mxu0 }
  0xe7   :  { %v401_v26 = vpop.f32.mrf.mxu1  ;;  %v367_v27 = vadd.f32 %v366_v25, %v365_v22 }
  0xe8   :  { %v402_v29 = vadd.f32 %v401_v26, %v400_v23 }
  0xe9   :  { %v241_v28 = vadd.f32 %v367_v27, %v332_v24 }
  0xeb   :  { %v311_v30 = vadd.f32 %v402_v29, %v241_v28 }
  0xed   :  { %315 = vst.msk [vmem:[#allocation2] sm:$0xff] %vm314_vm0, %v311_v30 }
  0xee   :  { %320 = vsyncadd [#allocation3], 112  ;;  %s438_s13 = smov [#allocation2]  }
  0xef   :  { %s321_s14 = sshll.u32 %s438_s13, 4  ;;  %s322_s14 = int_to_ptr.vmem [resolvable:$true] %s321_s14 }
  0xf0   :  { %s415_s15 = scalar_lea.vmem %s322_s14, 16  ;;  %s419_s16 = scalar_lea.vmem %s322_s14, 128 }
  0xf1   :  { %p416_p0 = scmp.ne.s32.totalorder %s322_s14, %s415_s15  ;;  %p420_p1 = scmp.lt.s32.totalorder %s322_s14, %s322_s14 }
  0xf2   :  { %p421_p2 = scmp.lt.s32.totalorder %s419_s16, %s415_s15 }
  0xf4   :  { %p422_p3 = por %p421_p2, %p420_p1 }
  0xf6   :  { %p423_p4 = pnand %p422_p3, %p416_p0 }
  0xf8   :  { %426 = shalt.err (!%p423_p4)
}
  0xf9   :  { %s439_s2 = smov 16   ;;  %s440_s17 = smov 1  }
  0xfa   :  { %327 = dma.vmem_to_hbm [thread:$0]  %s322_s14, 16, %s674_s3, [#allocation3], %s439_s2, %s439_s2, %s440_s17  }
  0xfb   :  { %435 = dma.done.wait [#allocation3], 128  }
  0xfc   :  { %436 = vsyncadd [#allocation3], 4294967168 }
  0xfd   :  { %331 = vsyncpa [#allocation3], 1 }

</bundles_post_ra>
